<compile_context>
chip_gen: v5e
topology: v5e:2x2
jax: 0.10.0
libtpu: 0.0.40
codegen_flags: <defaults>
</compile_context>

<pallas_src>
import functools

import jax
import jax.numpy as jnp
from jax.experimental import pallas as pl
from jax.experimental.pallas import tpu as pltpu


def _cyclemask_kernel(fake_ref, real_ref, mask_ref, out_ref, *, C, sub):
    # Refs (leading batch/tile dims squeezed):
    #   fake_ref / real_ref : (C, TS, 128)   input dtype (f32 or bf16)
    #   mask_ref            : (1, TS, 128)
    #   out_ref             : (sub, 128)     per-(batch, tile) partial sums, f32
    #
    # sum_c ((f_c - r_c) * m)^2 == (sum_c (f_c - r_c)^2) * m^2  -> mask applied
    # once, AFTER the channel sum.
    d = fake_ref[0].astype(jnp.float32) - real_ref[0].astype(jnp.float32)
    acc = d * d
    for c in range(1, C):                       # static unrolled channel loop
        d = fake_ref[c].astype(jnp.float32) - real_ref[c].astype(jnp.float32)
        acc = acc + d * d

    m = 1.0 - mask_ref[0].astype(jnp.float32)   # the 0.5 factor is folded into
    acc = acc * (m * m)                         # the wrapper's mean scale (0.25)

    ts = acc.shape[0]
    if sub == 8:
        partial = jnp.sum(acc.reshape(ts // 8, 8, 128), axis=0)     # (8, 128)
    else:
        # tiny-image fallback (TS not a multiple of 8); perf-irrelevant path
        partial = jnp.sum(acc, axis=0, keepdims=True)               # (1, 128)

    out_ref[...] = partial


def _pick_ts(R, N, C, in_itemsize, mask_itemsize):
    """Row-tile TS: divides R, respects min sublane tiling of both dtypes,
    ~<=4 MiB per (C, TS, 128) input block, and yields >=2 grid points when
    possible so both v7x TensorCores get work even at batch 1."""
    sub_req = max(8 * (4 // in_itemsize), 8 * (4 // mask_itemsize))
    if R < sub_req or R % sub_req != 0:
        return R, (8 if R % 8 == 0 else 1)      # single full spatial block
    budget = 4 * 1024 * 1024                    # bytes per (C, TS, 128) block
    max_ts = max(sub_req,
                 (budget // (C * 128 * in_itemsize)) // sub_req * sub_req)
    ts = max(sub_req, min(R, max_ts) // sub_req * sub_req)
    while R % ts != 0:
        ts -= sub_req
    # Megacore: if the whole problem would be a single grid point, split it.
    if N * (R // ts) < 2 and R >= 2 * sub_req:
        half = (R // 2) // sub_req * sub_req
        while half >= sub_req and R % half != 0:
            half -= sub_req
        if half >= sub_req:
            ts = half
    return ts, 8


def cyclemaskloss(fake_B, real_A, mask):
    """fake_B, real_A: (N, C, H, W); mask: (N, 1, H, W). Returns scalar f32."""
    N, C, H, W = fake_B.shape
    assert real_A.shape == (N, C, H, W)
    assert mask.shape == (N, 1, H, W)
    HW = H * W
    # mean over the UNPADDED element count; 0.25 folds ((1-mask)/2)^2 's scale
    # out of the kernel.
    scale = 0.25 / float(N * C * HW)

    # Lane-dense layout: (..., R, 128).  Padding (mask padded with 1.0 -> zero
    # weight) only happens when HW % 128 != 0; common image sizes skip it.
    HW_pad = ((HW + 127) // 128) * 128
    fake2 = fake_B.reshape(N, C, HW)
    real2 = real_A.reshape(N, C, HW)
    mask2 = mask.reshape(N, 1, HW)
    if HW_pad != HW:
        pad = HW_pad - HW
        fake2 = jnp.pad(fake2, ((0, 0), (0, 0), (0, pad)))
        real2 = jnp.pad(real2, ((0, 0), (0, 0), (0, pad)))
        mask2 = jnp.pad(mask2, ((0, 0), (0, 0), (0, pad)), constant_values=1.0)
    R = HW_pad // 128

    fake4 = fake2.reshape(N, C, R, 128)
    real4 = real2.reshape(N, C, R, 128)
    mask4 = mask2.reshape(N, 1, R, 128)

    in_itemsize = jnp.dtype(fake_B.dtype).itemsize
    mask_itemsize = jnp.dtype(mask.dtype).itemsize
    ts, sub = _pick_ts(R, N, C, in_itemsize, mask_itemsize)
    num_t = R // ts

    kernel = functools.partial(_cyclemask_kernel, C=C, sub=sub)

    bytes_accessed = (2 * N * C * HW_pad * in_itemsize
                      + N * HW_pad * mask_itemsize
                      + N * num_t * sub * 128 * 4)
    cost = pl.CostEstimate(flops=6 * N * C * HW_pad, transcendentals=0,
                           bytes_accessed=bytes_accessed)

    partials = pl.pallas_call(
        kernel,
        out_shape=jax.ShapeDtypeStruct((N, num_t, sub, 128), jnp.float32),
        grid_spec=pltpu.PrefetchScalarGridSpec(
            num_scalar_prefetch=0,
            grid=(N, num_t),
            in_specs=[
                pl.BlockSpec((None, C, ts, 128), lambda b, t: (b, 0, t, 0)),
                pl.BlockSpec((None, C, ts, 128), lambda b, t: (b, 0, t, 0)),
                pl.BlockSpec((None, 1, ts, 128), lambda b, t: (b, 0, t, 0)),
            ],
            out_specs=pl.BlockSpec((None, None, sub, 128),
                                   lambda b, t: (b, t, 0, 0)),
        ),
        compiler_params=pltpu.CompilerParams(
            dimension_semantics=("parallel", "parallel"),
            vmem_limit_bytes=48 * 1024 * 1024),
        cost_estimate=cost,
    )(fake4, real4, mask4)

    # Single final cross-lane/tile reduce + mean scaling (tiny, done in XLA).
    return jnp.sum(partials) * jnp.float32(scale)


if __name__ == "__main__":
    key = jax.random.PRNGKey(0)
    k1, k2, k3 = jax.random.split(key, 3)

    N, C, H, W = 2, 3, 16, 16
    fake_B = jax.random.normal(k1, (N, C, H, W), dtype=jnp.float32)
    real_A = jax.random.normal(k2, (N, C, H, W), dtype=jnp.float32)
    # mask values in {-1, +1} like a typical GAN mask; module maps them to {1, 0}.
    mask = (jax.random.uniform(k3, (N, 1, H, W)) > 0.5).astype(jnp.float32) * 2.0 - 1.0

    loss = cyclemaskloss(fake_B, real_A, mask)
    jax.block_until_ready(loss)

    # pure-JAX reference for correctness check
    m = (1.0 - mask) / 2.0
    m3 = jnp.repeat(m, C, axis=1)
    ref = jnp.mean((fake_B * m3 - real_A * m3) ** 2)
    assert abs(float(loss) - float(ref)) < 1e-5, (float(loss), float(ref))

    print("KERNEL_OK")
</pallas_src>

<mosaic_0001>
module attributes {stable_mosaic.version = 11 : i64} {
  func.func @_cyclemask_kernel(%arg0: i32, %arg1: i32, %arg2: memref<1x3x2x128xf32, #tpu.memory_space<vmem>>, %arg3: memref<1x3x2x128xf32, #tpu.memory_space<vmem>>, %arg4: memref<1x1x2x128xf32, #tpu.memory_space<vmem>>, %arg5: memref<1x1x1x128xf32, #tpu.memory_space<vmem>>) attributes {dimension_semantics = [#tpu.dimension_semantics<parallel>, #tpu.dimension_semantics<parallel>], iteration_bounds = array<i64: 2, 1>, scalar_prefetch = 0 : i64, scratch_operands = 0 : i64, tpu.core_type = #tpu.core_type<tc>, window_params = [{transform_indices = @transform_0, window_bounds = array<i64: 1, 3, 2, 128>}, {transform_indices = @transform_1, window_bounds = array<i64: 1, 3, 2, 128>}, {transform_indices = @transform_2, window_bounds = array<i64: 1, 1, 2, 128>}, {transform_indices = @transform_3, window_bounds = array<i64: 1, 1, 1, 128>}]} {
    %c0 = arith.constant 0 : index
    %c0_0 = arith.constant 0 : index
    %c0_1 = arith.constant 0 : index
    %c0_2 = arith.constant 0 : index
    %0 = vector.load %arg2[%c0, %c0_0, %c0_1, %c0_2] : memref<1x3x2x128xf32, #tpu.memory_space<vmem>>, vector<1x1x2x128xf32>
    %1 = vector.shape_cast %0 : vector<1x1x2x128xf32> to vector<2x128xf32>
    %c0_3 = arith.constant 0 : index
    %c0_4 = arith.constant 0 : index
    %c0_5 = arith.constant 0 : index
    %c0_6 = arith.constant 0 : index
    %2 = vector.load %arg3[%c0_3, %c0_4, %c0_5, %c0_6] : memref<1x3x2x128xf32, #tpu.memory_space<vmem>>, vector<1x1x2x128xf32>
    %3 = vector.shape_cast %2 : vector<1x1x2x128xf32> to vector<2x128xf32>
    %4 = arith.subf %1, %3 : vector<2x128xf32>
    %5 = arith.mulf %4, %4 : vector<2x128xf32>
    %c0_7 = arith.constant 0 : index
    %c1 = arith.constant 1 : index
    %c0_8 = arith.constant 0 : index
    %c0_9 = arith.constant 0 : index
    %6 = vector.load %arg2[%c0_7, %c1, %c0_8, %c0_9] : memref<1x3x2x128xf32, #tpu.memory_space<vmem>>, vector<1x1x2x128xf32>
    %7 = vector.shape_cast %6 : vector<1x1x2x128xf32> to vector<2x128xf32>
    %c0_10 = arith.constant 0 : index
    %c1_11 = arith.constant 1 : index
    %c0_12 = arith.constant 0 : index
    %c0_13 = arith.constant 0 : index
    %8 = vector.load %arg3[%c0_10, %c1_11, %c0_12, %c0_13] : memref<1x3x2x128xf32, #tpu.memory_space<vmem>>, vector<1x1x2x128xf32>
    %9 = vector.shape_cast %8 : vector<1x1x2x128xf32> to vector<2x128xf32>
    %10 = arith.subf %7, %9 : vector<2x128xf32>
    %11 = arith.mulf %10, %10 : vector<2x128xf32>
    %12 = arith.addf %5, %11 : vector<2x128xf32>
    %c0_14 = arith.constant 0 : index
    %c2 = arith.constant 2 : index
    %c0_15 = arith.constant 0 : index
    %c0_16 = arith.constant 0 : index
    %13 = vector.load %arg2[%c0_14, %c2, %c0_15, %c0_16] : memref<1x3x2x128xf32, #tpu.memory_space<vmem>>, vector<1x1x2x128xf32>
    %14 = vector.shape_cast %13 : vector<1x1x2x128xf32> to vector<2x128xf32>
    %c0_17 = arith.constant 0 : index
    %c2_18 = arith.constant 2 : index
    %c0_19 = arith.constant 0 : index
    %c0_20 = arith.constant 0 : index
    %15 = vector.load %arg3[%c0_17, %c2_18, %c0_19, %c0_20] : memref<1x3x2x128xf32, #tpu.memory_space<vmem>>, vector<1x1x2x128xf32>
    %16 = vector.shape_cast %15 : vector<1x1x2x128xf32> to vector<2x128xf32>
    %17 = arith.subf %14, %16 : vector<2x128xf32>
    %18 = arith.mulf %17, %17 : vector<2x128xf32>
    %19 = arith.addf %12, %18 : vector<2x128xf32>
    %c0_21 = arith.constant 0 : index
    %c0_22 = arith.constant 0 : index
    %c0_23 = arith.constant 0 : index
    %c0_24 = arith.constant 0 : index
    %20 = vector.load %arg4[%c0_21, %c0_22, %c0_23, %c0_24] : memref<1x1x2x128xf32, #tpu.memory_space<vmem>>, vector<1x1x2x128xf32>
    %21 = vector.shape_cast %20 : vector<1x1x2x128xf32> to vector<2x128xf32>
    %cst = arith.constant 1.000000e+00 : f32
    %22 = vector.broadcast %cst : f32 to vector<2x128xf32>
    %23 = arith.subf %22, %21 : vector<2x128xf32>
    %24 = arith.mulf %23, %23 : vector<2x128xf32>
    %25 = arith.mulf %19, %24 : vector<2x128xf32>
    %cst_25 = arith.constant dense<0.000000e+00> : vector<128xf32>
    %26 = vector.multi_reduction <add>, %25, %cst_25 [0] : vector<2x128xf32> to vector<128xf32>
    %27 = vector.shape_cast %26 : vector<128xf32> to vector<1x128xf32>
    %c0_26 = arith.constant 0 : index
    %c0_27 = arith.constant 0 : index
    %c0_28 = arith.constant 0 : index
    %c0_29 = arith.constant 0 : index
    %28 = vector.load %arg5[%c0_26, %c0_27, %c0_28, %c0_29] : memref<1x1x1x128xf32, #tpu.memory_space<vmem>>, vector<1x1x1x128xf32>
    %29 = vector.shape_cast %28 : vector<1x1x1x128xf32> to vector<1x128xf32>
    %30 = vector.shape_cast %27 : vector<1x128xf32> to vector<1x1x1x128xf32>
    tpu.vector_store %arg5[%c0_26, %c0_27, %c0_28, %c0_29], %30 {strides = array<i32>} : memref<1x1x1x128xf32, #tpu.memory_space<vmem>>, vector<1x1x1x128xf32>,
    return
  }
  func.func @transform_0(%arg0: i32, %arg1: i32) -> (i32, i32, i32, i32) {
    %c0_i32 = arith.constant 0 : i32
    %c0_i32_0 = arith.constant 0 : i32
    %c0_i32_1 = arith.constant 0 : i32
    return %arg0, %c0_i32, %arg1, %c0_i32_0 : i32, i32, i32, i32
  }
  func.func @transform_1(%arg0: i32, %arg1: i32) -> (i32, i32, i32, i32) {
    %c0_i32 = arith.constant 0 : i32
    %c0_i32_0 = arith.constant 0 : i32
    %c0_i32_1 = arith.constant 0 : i32
    return %arg0, %c0_i32, %arg1, %c0_i32_0 : i32, i32, i32, i32
  }
  func.func @transform_2(%arg0: i32, %arg1: i32) -> (i32, i32, i32, i32) {
    %c0_i32 = arith.constant 0 : i32
    %c0_i32_0 = arith.constant 0 : i32
    %c0_i32_1 = arith.constant 0 : i32
    return %arg0, %c0_i32, %arg1, %c0_i32_0 : i32, i32, i32, i32
  }
  func.func @transform_3(%arg0: i32, %arg1: i32) -> (i32, i32, i32, i32) {
    %c0_i32 = arith.constant 0 : i32
    %c0_i32_0 = arith.constant 0 : i32
    %c0_i32_1 = arith.constant 0 : i32
    return %arg0, %arg1, %c0_i32, %c0_i32_0 : i32, i32, i32, i32
  }
}

</mosaic_0001>

<bundles_post_ra>
// kernel: tpu_custom_call.1
= control target key start
LH: loop header
LB: loop body
LE: loop exit
PB: predicated region body
PF: predicated region fallthrough
CT: control target
= control target key end

     0   :  { %s914_s0 = inlined_call_operand.hbm [shape: f32[2,3,2,128], index: 0, kind: input, shape index: {}]   ;;  %s915_s1 = inlined_call_operand.hbm [shape: f32[2,3,2,128], index: 1, kind: input, shape index: {}]   ;;  %s916_s2 = inlined_call_operand.hbm [shape: f32[2,1,2,128], index: 2, kind: input, shape index: {}]   ;;  %s917_s3 = inlined_call_operand.hbm [shape: f32[2,1,1,128], index: 3, kind: output, shape index: {}]  }
   0x1   :  { %926 = sst [smem:[#allocation19_spill]] %s915_s1 }
   0x2   :  { %8 = vsyncpa [#allocation3], 0 }
   0x3   :  { %10 = vsyncpa [#allocation3 + $0x1], 0 }
   0x4   :  { %11 = vsyncpa [#allocation6], 0 }
   0x5   :  { %13 = vsyncpa [#allocation6 + $0x1], 0 }
   0x6   :  { %14 = vsyncpa [#allocation4], 0 }
   0x7   :  { %16 = vsyncpa [#allocation4 + $0x1], 0  ;;  %s754_s12 = smov 0   ;;  %s756_s13 = smov 0  }
   0x8   :  { %s758_s14 = smov 0   ;;  %s760_s15 = smov 0  }
   0x9   :  { %s762_s16 = smov 0   ;;  %s764_s17 = smov 0  }
   0xa LB: > { %927 = sst [smem:[#allocation12_spill]] %s710_s12  ;;  %s785_s18 = sadd.s32 4294967295, %s730_s17   ;;  %s730_s17 = sphi %s764_s17, %s22_s17   ;;  %s726_s16 = sphi %s762_s16, %s952_s16   ;;  %s722_s15 = sphi %s760_s15, %s951_s15   ;;  %s718_s14 = sphi %s758_s14, %s950_s14   ;;  %s714_s13 = sphi %s756_s13, %s949_s13   ;;  %s710_s12 = sphi %s754_s12, %s948_s12  }
   0xb   : > { %928 = sst [smem:[#allocation13_spill]] %s718_s14  ;;  %s460_s19 = sadd.s32 4294967294, %s730_s17  }
   0xc   : > { %929 = sst [smem:[#allocation14_spill]] %s730_s17  ;;  %s34_s20 = sadd.s32 1, %s726_s16 }
   0xd   : > { %s43_s21 = sadd.s32 1, %s718_s14  ;;  %p36_p0 = scmp.ge.s32.totalorder %s34_s20, 2 }
   0xe   : > { %p50_p1 = scmp.ne.s32.totalorder %s718_s14, %s714_s13  ;;  %p51_p2 = scmp.eq.s32.totalorder %s730_s17, 0 }
   0xf   : > { %p56_p3 = scmp.ne.s32.totalorder %s714_s13, %s710_s12  ;;  %s954_s20 = smov (%p36_p0, %s34_s20), 0 }
  0x10   : > { %930 = sst [smem:[#allocation15_spill]] %s954_s20  ;;  %p797_p4 = por %p51_p2, %p50_p1 }
  0x11   : > { %p57_p5 = scmp.eq.s32.totalorder %s785_s18, 0  ;;  %s38_s23 = ssub.s32 %s726_s16, %s954_s20 }
  0x12   : > { %p138_p6 = scmp.eq.s32.totalorder %s785_s18, 1  ;;  %p41_p7 = scmp.eq.s32.totalorder %s38_s23, 0 }
  0x13   : > { %p805_p8 = por %p57_p5, %p56_p3  ;;  %p144_p10 = scmp.eq.s32.totalorder %s460_s19, 1 }
  0x14   : > { %p809_p9 = por %p138_p6, %p50_p1  ;;  %p462_p12 = scmp.ge.s32.totalorder %s730_s17, 2 }
  0x15   : > { %s814_s26 = scalar_select %p41_p7, %s718_s14, %s43_s21  }
  0x16   : > { %s933_s25 = scalar_select %p809_p9, 1, 0 }
  0x17   : > { %935 = sst [smem:[#allocation17_spill]] %s814_s26  ;;  %p816_p11 = por %p144_p10, %p56_p3 }
  0x18   : > { %934 = sst [smem:[#allocation16_spill]] %s933_s25  ;;  %p502_p13 = scmp.lt.s32.totalorder %s730_s17, 2 }
  0x19   : > { %s936_s27 = scalar_select %p816_p11, 1, 0 }
  0x1a   : > { %s823_s28 = sand.u32 1, %s718_s14   ;;  %s476_s30 = smul.u32 6, %s726_s16 }
  0x1b   : > { %937 = sst [smem:[#allocation18_spill]] %s936_s27  ;;  %s475_s29 = smul.u32 6, %s823_s28 }
  0x1c   : > { %p829_p0 = pnand %p502_p13, %p797_p4  ;;  %s187_s5 = sand.u32 1, %s730_s17  }
  0x1d   : > { %s939_s1 = sld [smem:[#allocation19_spill]]  ;;  %s191_s10 = scalar_lea.vmem [#allocation5], %s475_s29 }
  0x1e   : > { %s200_s11 = sshll.u32 %s191_s10, 4  ;;  %s188_s19 = scalar_lea.sflag [#allocation6], %s187_s5  ;;  %s201_s11 = int_to_ptr.vmem [resolvable:$true] %s200_s11 }
  0x1f   : > { %s732_s21 = smov 32   ;;  %s733_s22 = smov 2  }
  0x20   : > { %p467_p1 = scmp.ge.s32.totalorder %s730_s17, 1  ;;  %p228_p2 = scmp.lt.s32.totalorder %s730_s17, 3 }
  0x21   : > { %s165_s5 = scalar_lea.sflag [#allocation3], %s823_s28 }
  0x22   : > { %p841_p3 = pnand %p467_p1, %p228_p2 }
  0x23   : > { %s197_s8 = scalar_lea.hbm %s939_s1, %s476_s30  ;;  %s168_s1 = scalar_lea.vmem [#allocation2], %s475_s29 }
  0x24   : > { %s198_s9 = sshll.u32 %s197_s8, 4  ;;  %s174_s8 = scalar_lea.hbm %s914_s0, %s476_s30  ;;  %s199_s9 = int_to_ptr.hbm [resolvable:$true] %s198_s9 }
  0x25   : > { %494 = dma.hbm_to_vmem [thread:$0]  (!%p829_p0), %s199_s9, 96, %s201_s11, %s188_s19, %s732_s21, %s732_s21, %s733_s22  }
  0x26   : > { %s175_s10 = sshll.u32 %s174_s8, 4  ;;  %s177_s20 = sshll.u32 %s168_s1, 4  ;;  %s176_s10 = int_to_ptr.hbm [resolvable:$true] %s175_s10  ;;  %s178_s20 = int_to_ptr.vmem [resolvable:$true] %s177_s20 }
  0x27   : > { %491 = dma.hbm_to_vmem [thread:$0]  (!%p829_p0), %s176_s10, 96, %s178_s20, %s165_s5, %s732_s21, %s732_s21, %s733_s22  }
  0x28   : > { %s465_s9 = sshll.u32 %s823_s28, 1  ;;  %s466_s11 = sshll.u32 %s726_s16, 1 }
  0x29   : > { %s219_s17 = scalar_lea.hbm %s916_s2, %s466_s11  ;;  %s214_s12 = scalar_lea.vmem [#allocation7], %s465_s9 }
  0x2a   : > { %s221_s27 = sshll.u32 %s219_s17, 4  ;;  %s223_s25 = sshll.u32 %s214_s12, 4  ;;  %s222_s27 = int_to_ptr.hbm [resolvable:$true] %s221_s27  ;;  %s224_s25 = int_to_ptr.vmem [resolvable:$true] %s223_s25 }
  0x2b   : > { %497 = dma.hbm_to_vmem [thread:$0]  (!%p829_p0), %s222_s27, 32, %s224_s25, %s188_s19  }
  0x2c   : > { %232 = sbr.rel (%p841_p3) target bundleno = 81 (0x51), region = 32  ;;  %s861_s1 = sand.u32 (!%p841_p3), 1, %s714_s13  }
  0x2d   : > { %s479_s20 = smul.u32 (!%p841_p3), 6, %s861_s1  ;;  %s235_s28 = scalar_lea.sflag (!%p841_p3), [#allocation3], %s861_s1 }
  0x2f   : > { %s238_s14 = scalar_lea.vmem (!%p841_p3), [#allocation2], %s479_s20 }
  0x31   : > { %697 = dma.done.wait (%p805_p8), %s235_s28, 96  }
  0x32   : > { %699 = vsyncadd (%p805_p8), %s235_s28, 4294967200  ;;  %s244_s12 = sand.u32 1, %s785_s18   ;;  %s248_s25 = scalar_lea.vmem [#allocation5], %s479_s20 }
  0x33   : > { %s245_s17 = scalar_lea.sflag [#allocation6], %s244_s12 }
  0x34   : > { %701 = dma.done.wait (%p805_p8), %s245_s17, 128  }
  0x35   : > { %703 = vsyncadd (%p805_p8), %s245_s17, 4294967168  ;;  %s468_s26 = sshll.u32 %s861_s1, 1  ;;  %v291_v0 = vld [vmem:[%s238_s14] sm:$0x3]  ;;  %v292_v1 = vld [vmem:[%s248_s25] sm:$0x3]  ;;  %s332_s30 = scalar_lea.hbm %s917_s3, %s722_s15 }
  0x36   : > { %v469_v2 = vld [vmem:[%s238_s14 + $0x2] sm:$0x3]  ;;  %v293_v3 = vsub.f32 %v291_v0, %v292_v1  ;;  %v470_v4 = vld [vmem:[%s248_s25 + $0x2] sm:$0x3]  ;;  %v471_v5 = vld [vmem:[%s238_s14 + $0x4] sm:$0x3] }
  0x37   : > { %v472_v6 = vld [vmem:[%s248_s25 + $0x4] sm:$0x3]  ;;  %v299_v7 = vsub.f32 %v469_v2, %v470_v4  ;;  %s258_s18 = scalar_lea.vmem [#allocation7], %s468_s26  ;;  %vm313_vm0 = vcmask 1041408   ;;  %s290_s4 = scalar_lea.vmem [#allocation8], %s861_s1 }
  0x38   : > { %v306_v8 = vsub.f32 %v471_v5, %v472_v6  ;;  %v309_v9 = vld [vmem:[%s258_s18] sm:$0x3]  ;;  %v294_v10 = vmul.f32 %v293_v3, %v293_v3  ;;  %s334_s19 = sshll.u32 %s290_s4, 4  ;;  %s336_s21 = sshll.u32 %s332_s30, 4  ;;  %s335_s19 = int_to_ptr.vmem [resolvable:$true] %s334_s19  ;;  %s337_s21 = int_to_ptr.hbm [resolvable:$true] %s336_s21 }
  0x39   : > { %v310_v11 = vsub.f32 1.0, %v309_v9  ;;  %v300_v12 = vmul.f32 %v299_v7, %v299_v7  ;;  %s323_s22 = scalar_lea.sflag [#allocation4], %s861_s1  ;;  %s658_s23 = sshra.s32 %s337_s21, 4  ;;  %s659_s23 = int_to_ptr.hbm [resolvable:$true] %s658_s23 }
  0x3a   : > { %v307_v13 = vmul.f32 %v306_v8, %v306_v8  ;;  %s660_s6 = scalar_lea.hbm %s659_s23, 1  ;;  %s664_s15 = scalar_lea.hbm %s917_s3, 2 }
  0x3b   : > { %v301_v14 = vadd.f32 %v300_v12, %v294_v10  ;;  %v311_v15 = vmul.f32 %v310_v11, %v310_v11  ;;  %p661_p4 = scmp.ne.s32.totalorder %s659_s23, %s660_s6  ;;  %p665_p7 = scmp.lt.s32.totalorder %s659_s23, %s917_s3 }
  0x3c   : > { %p666_p8 = scmp.lt.s32.totalorder %s664_s15, %s660_s6 }
  0x3d   : > { %v308_v16 = vadd.f32 %v307_v13, %v301_v14  ;;  %p662_p5 = pnand %p661_p4, %p809_p9 }
  0x3e   : > { %p667_p10 = por %p666_p8, %p665_p7 }
  0x3f   : > { %v312_v17 = vmul.f32 %v311_v15, %v308_v16  ;;  %p663_p6 = pneg %p662_p5 }
  0x41   : > { %v314_v18 = vsel %vm313_vm0, %v312_v17, 0.0  ;;  %p668_p13 = pnand %p667_p10, %p663_p6 }
  0x42   : > { %v315_v19 = vrot.slane %v314_v18, 4 }
  0x44   : > { %v316_v20 = vadd.f32 %v315_v19, %v314_v18 }
  0x46   : > { %v317_v21 = vrot.slane %v316_v20, 2 }
  0x48   : > { %v318_v22 = vadd.f32 %v317_v21, %v316_v20 }
  0x4a   : > { %v319_v23 = vrot.slane %v318_v22, 1 }
  0x4c   : > { %v320_v24 = vadd.f32 %v319_v23, %v318_v22 }
  0x4e   : > { %321 = vst [vmem:[%s290_s4] sm:$0x1] %v320_v24 }
  0x4f   : > { %671 = shalt.err (!%p668_p13)
}
  0x50   : > { %486 = dma.vmem_to_hbm [thread:$0]  (%p809_p9), %s335_s19, 16, %s337_s21, %s323_s22  }
  0x51 PF: > { %s942_s9 = sld [smem:[#allocation12_spill]]  ;;  %p499_p0 = pnand %p462_p12, %p816_p11 }
  0x52   : > { %s944_s1 = sld [smem:[#allocation14_spill]] }
  0x53   : > { %p500_p1 = pneg %p499_p0 }
  0x57   : > { %s348_s20 = sand.u32 1, %s942_s9  }
  0x58   : > { %s349_s28 = scalar_lea.sflag [#allocation4], %s348_s20 }
  0x59   : > { %705 = dma.done.wait (%p500_p1), %s349_s28, 16  }
  0x5a   : > { %707 = vsyncadd (%p500_p1), %s349_s28, 4294967280  ;;  %s22_s17 = sadd.s32 1, %s944_s1   ;;  %s945_s14 = sld [smem:[#allocation13_spill]] }
  0x5b   : > { %p19_p2 = scmp.ge.s32.totalorder %s22_s17, 4   ;;  %s946_s25 = sld [smem:[#allocation17_spill]] }
  0x5c   : > { %s947_s26 = sld [smem:[#allocation15_spill]]  ;;  %s948_s12 = smov %s714_s13 }
  0x5d   : > { %s951_s15 = smov %s726_s16 }
  0x5e   :  { %21 = sbr.rel (!%p19_p2) target bundleno = 10 (0xa), region = 105 }
  0x60   : > { %s949_s13 = smov %s945_s14 }
  0x61   : > { %s950_s14 = smov %s946_s25 }
  0x62   : > { %s952_s16 = smov %s947_s26 }
  0x63   :  { %354 = vsyncpa [#allocation3], 1 }
  0x64   :  { %356 = vsyncpa [#allocation3 + $0x1], 1 }
  0x65   :  { %357 = vsyncpa [#allocation6], 1 }
  0x66   :  { %359 = vsyncpa [#allocation6 + $0x1], 1 }
  0x67   :  { %360 = vsyncpa [#allocation4], 1 }
  0x68   :  { %362 = vsyncpa [#allocation4 + $0x1], 1 }

</bundles_post_ra>
